<compile_context>
chip_gen: v7x
topology: tpu7x:2x2x1
jax: 0.10.0
libtpu: 0.0.40
codegen_flags: <defaults>
</compile_context>

<pallas_src>
import jax
import jax.numpy as jnp
from jax.experimental import pallas as pl
from jax.experimental.pallas import tpu as pltpu


def qnetwork_kernel(x_ref, w1_ref, w2_ref, w3_ref, b_ref, o_ref):
    x = x_ref[...]        # [tm, obs] f32
    w1 = w1_ref[...]      # [obs, H]  f32
    b = b_ref[...]        # [3,  H]   f32  (b1, b2, b3_padded)

    # ---- layer 1 (K = obs, tiny): unrolled VPU broadcast-FMA instead of an MXU pass ----
    obs = x.shape[1]
    acc = x[:, 0:1] * w1[0:1, :]
    for k in range(1, obs):                       # static unroll, obs is tiny
        acc = acc + x[:, k:k + 1] * w1[k:k + 1, :]
    h = jnp.maximum(acc + b[0:1, :], 0.0)         # [tm, H] f32

    # ---- layer 2 (128x128): bf16 MXU inputs, f32 accumulation, f32 elementwise ----
    h2 = jnp.dot(h.astype(jnp.bfloat16), w2_ref[...],
                 preferred_element_type=jnp.float32)
    h2 = jnp.maximum(h2 + b[1:2, :], 0.0)         # [tm, H] f32

    # ---- layer 3 (out dim padded to H lanes for a lane-dense store) ----
    out = jnp.dot(h2.astype(jnp.bfloat16), w3_ref[...],
                  preferred_element_type=jnp.float32) + b[2:3, :]
    o_ref[...] = out                              # [tm, H] f32


def qnetwork_forward(x, params):
    """x: [B, obs] float32.  Returns [B, action_size] float32 Q-values."""
    w1, w2, w3, b = params["w1"], params["w2"], params["w3"], params["b"]
    act = params["action_size"]
    H = params["hidden"]
    B, obs = x.shape

    def round_up(v, m):
        return (v + m - 1) // m * m

    # Small B -> single step (tm = ceil8(B)); large B -> 256-row tiles over a grid.
    tm = 256 if B > 256 else round_up(B, 8)
    B_pad = round_up(B, tm)
    if B_pad != B:
        x = jnp.pad(x, ((0, B_pad - B), (0, 0)))
    grid = (B_pad // tm,)

    out = pl.pallas_call(
        qnetwork_kernel,
        out_shape=jax.ShapeDtypeStruct((B_pad, H), jnp.float32),
        grid=grid,
        in_specs=[
            pl.BlockSpec((tm, obs), lambda i: (i, 0)),   # activations: tile over B
            pl.BlockSpec((obs, H), lambda i: (0, 0)),    # w1 resident
            pl.BlockSpec((H, H), lambda i: (0, 0)),      # w2 resident (bf16)
            pl.BlockSpec((H, H), lambda i: (0, 0)),      # w3 resident (bf16, padded)
            pl.BlockSpec((3, H), lambda i: (0, 0)),      # packed biases resident
        ],
        out_specs=pl.BlockSpec((tm, H), lambda i: (i, 0)),
        compiler_params=pltpu.CompilerParams(
            dimension_semantics=("parallel",)),          # v7x: shard batch over 2 TCs
    )(x, w1, w2, w3, b)

    return out[:B, :act]


def init_params(key, observation_size, action_size, hidden=128):
    """Deterministic init mirroring nn.Linear's U(-1/sqrt(in), 1/sqrt(in))."""
    assert action_size <= hidden

    def linear(k, fan_in, fan_out):
        kw, kb = jax.random.split(k)
        bound = 1.0 / jnp.sqrt(jnp.float32(fan_in))
        w = jax.random.uniform(kw, (fan_in, fan_out), jnp.float32, -bound, bound)
        b = jax.random.uniform(kb, (fan_out,), jnp.float32, -bound, bound)
        return w, b

    k1, k2, k3 = jax.random.split(key, 3)
    w1, b1 = linear(k1, observation_size, hidden)
    w2, b2 = linear(k2, hidden, hidden)
    w3, b3 = linear(k3, hidden, action_size)

    # Pad layer-3 output dim to `hidden` lanes so the final store is lane-dense.
    w3p = jnp.zeros((hidden, hidden), jnp.float32).at[:, :action_size].set(w3)
    b3p = jnp.zeros((hidden,), jnp.float32).at[:action_size].set(b3)
    b_packed = jnp.stack([b1, b2, b3p], axis=0)          # [3, hidden] f32

    return {
        "w1": w1,                                        # [obs, H] f32 (VPU layer)
        "w2": w2.astype(jnp.bfloat16),                   # [H, H]  bf16 (MXU)
        "w3": w3p.astype(jnp.bfloat16),                  # [H, H]  bf16 (MXU, padded)
        "b": b_packed,                                   # [3, H]  f32
        "action_size": action_size,
        "hidden": hidden,
    }


def reference_forward(x, params):
    """Pure-JAX reference following the same dtype path as the kernel."""
    b = params["b"]
    act = params["action_size"]
    h = jnp.maximum(x @ params["w1"] + b[0:1, :], 0.0)
    h = jnp.dot(h.astype(jnp.bfloat16), params["w2"],
                preferred_element_type=jnp.float32)
    h = jnp.maximum(h + b[1:2, :], 0.0)
    out = jnp.dot(h.astype(jnp.bfloat16), params["w3"],
                  preferred_element_type=jnp.float32) + b[2:3, :]
    return out[:, :act]


if __name__ == "__main__":
    # CartPole: observation_size=4, action_size=2.
    observation_size, action_size = 4, 2

    key = jax.random.PRNGKey(0)
    kx, kx2, kx3, kp = jax.random.split(key, 4)
    params = init_params(kp, observation_size, action_size)

    # Small (rollout-sized) batch: single launch, no extra grid steps.
    x = jax.random.normal(kx, (8, observation_size), jnp.float32)
    out = jax.block_until_ready(qnetwork_forward(x, params))
    ref = reference_forward(x, params)
    assert out.shape == (8, action_size)
    assert jnp.allclose(out, ref, atol=2e-3, rtol=2e-3), "mismatch (B=8)"

    # Non-multiple-of-8 batch: exercises the padding/slicing path.
    x5 = jax.random.normal(kx3, (5, observation_size), jnp.float32)
    out5 = jax.block_until_ready(qnetwork_forward(x5, params))
    ref5 = reference_forward(x5, params)
    assert out5.shape == (5, action_size)
    assert jnp.allclose(out5, ref5, atol=2e-3, rtol=2e-3), "mismatch (B=5)"

    # Replay-minibatch-sized batch: 256-row tiles, grid over B, weights resident.
    xb = jax.random.normal(kx2, (512, observation_size), jnp.float32)
    outb = jax.block_until_ready(qnetwork_forward(xb, params))
    refb = reference_forward(xb, params)
    assert outb.shape == (512, action_size)
    assert jnp.allclose(outb, refb, atol=2e-3, rtol=2e-3), "mismatch (B=512)"

    print("KERNEL_OK")
</pallas_src>

<mosaic_0001>
module attributes {stable_mosaic.version = 11 : i64} {
  func.func @qnetwork_kernel(%arg0: i32, %arg1: memref<8x4xf32, #tpu.memory_space<vmem>>, %arg2: memref<4x128xf32, #tpu.memory_space<vmem>>, %arg3: memref<128x128xbf16, #tpu.memory_space<vmem>>, %arg4: memref<128x128xbf16, #tpu.memory_space<vmem>>, %arg5: memref<3x128xf32, #tpu.memory_space<vmem>>, %arg6: memref<8x128xf32, #tpu.memory_space<vmem>>) attributes {dimension_semantics = [#tpu.dimension_semantics<parallel>], iteration_bounds = array<i64: 1>, scalar_prefetch = 0 : i64, scratch_operands = 0 : i64, tpu.core_type = #tpu.core_type<tc>, window_params = [{transform_indices = @transform_0, window_bounds = array<i64: 8, 4>}, {pipeline_mode = #tpu.pipeline_mode<synchronous>, transform_indices = @transform_1, window_bounds = array<i64: 4, 128>}, {pipeline_mode = #tpu.pipeline_mode<synchronous>, transform_indices = @transform_2, window_bounds = array<i64: 128, 128>}, {pipeline_mode = #tpu.pipeline_mode<synchronous>, transform_indices = @transform_3, window_bounds = array<i64: 128, 128>}, {pipeline_mode = #tpu.pipeline_mode<synchronous>, transform_indices = @transform_4, window_bounds = array<i64: 3, 128>}, {transform_indices = @transform_5, window_bounds = array<i64: 8, 128>}]} {
    %c0 = arith.constant 0 : index
    %c0_0 = arith.constant 0 : index
    %0 = vector.load %arg1[%c0, %c0_0] : memref<8x4xf32, #tpu.memory_space<vmem>>, vector<8x4xf32>
    %c0_1 = arith.constant 0 : index
    %c0_2 = arith.constant 0 : index
    %1 = vector.load %arg2[%c0_1, %c0_2] : memref<4x128xf32, #tpu.memory_space<vmem>>, vector<4x128xf32>
    %c0_3 = arith.constant 0 : index
    %c0_4 = arith.constant 0 : index
    %2 = vector.load %arg5[%c0_3, %c0_4] : memref<3x128xf32, #tpu.memory_space<vmem>>, vector<3x128xf32>
    %3 = vector.extract_strided_slice %0 {offsets = [0, 0], sizes = [8, 1], strides = [1, 1]} : vector<8x4xf32> to vector<8x1xf32>
    %4 = vector.extract_strided_slice %1 {offsets = [0, 0], sizes = [1, 128], strides = [1, 1]} : vector<4x128xf32> to vector<1x128xf32>
    %5 = vector.broadcast %3 : vector<8x1xf32> to vector<8x128xf32>
    %6 = vector.broadcast %4 : vector<1x128xf32> to vector<8x128xf32>
    %7 = arith.mulf %5, %6 : vector<8x128xf32>
    %8 = vector.extract_strided_slice %0 {offsets = [0, 1], sizes = [8, 1], strides = [1, 1]} : vector<8x4xf32> to vector<8x1xf32>
    %9 = vector.extract_strided_slice %1 {offsets = [1, 0], sizes = [1, 128], strides = [1, 1]} : vector<4x128xf32> to vector<1x128xf32>
    %10 = vector.broadcast %8 : vector<8x1xf32> to vector<8x128xf32>
    %11 = vector.broadcast %9 : vector<1x128xf32> to vector<8x128xf32>
    %12 = arith.mulf %10, %11 : vector<8x128xf32>
    %13 = arith.addf %7, %12 : vector<8x128xf32>
    %14 = vector.extract_strided_slice %0 {offsets = [0, 2], sizes = [8, 1], strides = [1, 1]} : vector<8x4xf32> to vector<8x1xf32>
    %15 = vector.extract_strided_slice %1 {offsets = [2, 0], sizes = [1, 128], strides = [1, 1]} : vector<4x128xf32> to vector<1x128xf32>
    %16 = vector.broadcast %14 : vector<8x1xf32> to vector<8x128xf32>
    %17 = vector.broadcast %15 : vector<1x128xf32> to vector<8x128xf32>
    %18 = arith.mulf %16, %17 : vector<8x128xf32>
    %19 = arith.addf %13, %18 : vector<8x128xf32>
    %20 = vector.extract_strided_slice %0 {offsets = [0, 3], sizes = [8, 1], strides = [1, 1]} : vector<8x4xf32> to vector<8x1xf32>
    %21 = vector.extract_strided_slice %1 {offsets = [3, 0], sizes = [1, 128], strides = [1, 1]} : vector<4x128xf32> to vector<1x128xf32>
    %22 = vector.broadcast %20 : vector<8x1xf32> to vector<8x128xf32>
    %23 = vector.broadcast %21 : vector<1x128xf32> to vector<8x128xf32>
    %24 = arith.mulf %22, %23 : vector<8x128xf32>
    %25 = arith.addf %19, %24 : vector<8x128xf32>
    %26 = vector.extract_strided_slice %2 {offsets = [0, 0], sizes = [1, 128], strides = [1, 1]} : vector<3x128xf32> to vector<1x128xf32>
    %27 = vector.broadcast %26 : vector<1x128xf32> to vector<8x128xf32>
    %28 = arith.addf %25, %27 : vector<8x128xf32>
    %cst = arith.constant 0.000000e+00 : f32
    %29 = vector.broadcast %cst : f32 to vector<8x128xf32>
    %30 = arith.maximumf %28, %29 : vector<8x128xf32>
    %31 = arith.truncf %30 : vector<8x128xf32> to vector<8x128xbf16>
    %c0_5 = arith.constant 0 : index
    %c0_6 = arith.constant 0 : index
    %32 = vector.load %arg3[%c0_5, %c0_6] : memref<128x128xbf16, #tpu.memory_space<vmem>>, vector<128x128xbf16>
    %cst_7 = arith.constant dense<0.000000e+00> : vector<8x128xf32>
    %33 = tpu.matmul %31, %32, %cst_7 {dimension_numbers = #tpu.dot_dimension_numbers<[1], [0], [0], [1], [0, 0, 1, 1], [], []>} : vector<8x128xbf16>, vector<128x128xbf16>, vector<8x128xf32> -> vector<8x128xf32>
    %34 = vector.extract_strided_slice %2 {offsets = [1, 0], sizes = [1, 128], strides = [1, 1]} : vector<3x128xf32> to vector<1x128xf32>
    %35 = vector.broadcast %34 : vector<1x128xf32> to vector<8x128xf32>
    %36 = arith.addf %33, %35 : vector<8x128xf32>
    %cst_8 = arith.constant 0.000000e+00 : f32
    %37 = vector.broadcast %cst_8 : f32 to vector<8x128xf32>
    %38 = arith.maximumf %36, %37 : vector<8x128xf32>
    %39 = arith.truncf %38 : vector<8x128xf32> to vector<8x128xbf16>
    %c0_9 = arith.constant 0 : index
    %c0_10 = arith.constant 0 : index
    %40 = vector.load %arg4[%c0_9, %c0_10] : memref<128x128xbf16, #tpu.memory_space<vmem>>, vector<128x128xbf16>
    %cst_11 = arith.constant dense<0.000000e+00> : vector<8x128xf32>
    %41 = tpu.matmul %39, %40, %cst_11 {dimension_numbers = #tpu.dot_dimension_numbers<[1], [0], [0], [1], [0, 0, 1, 1], [], []>} : vector<8x128xbf16>, vector<128x128xbf16>, vector<8x128xf32> -> vector<8x128xf32>
    %42 = vector.extract_strided_slice %2 {offsets = [2, 0], sizes = [1, 128], strides = [1, 1]} : vector<3x128xf32> to vector<1x128xf32>
    %43 = vector.broadcast %42 : vector<1x128xf32> to vector<8x128xf32>
    %44 = arith.addf %41, %43 : vector<8x128xf32>
    %c0_12 = arith.constant 0 : index
    %c0_13 = arith.constant 0 : index
    %45 = vector.load %arg6[%c0_12, %c0_13] : memref<8x128xf32, #tpu.memory_space<vmem>>, vector<8x128xf32>
    tpu.vector_store %arg6[%c0_12, %c0_13], %44 {strides = array<i32>} : memref<8x128xf32, #tpu.memory_space<vmem>>, vector<8x128xf32>,
    return
  }
  func.func @transform_0(%arg0: i32) -> (i32, i32) {
    %c0_i32 = arith.constant 0 : i32
    %c0_i32_0 = arith.constant 0 : i32
    return %arg0, %c0_i32 : i32, i32
  }
  func.func @transform_1(%arg0: i32) -> (i32, i32) {
    %c0_i32 = arith.constant 0 : i32
    %c0_i32_0 = arith.constant 0 : i32
    %c0_i32_1 = arith.constant 0 : i32
    return %c0_i32, %c0_i32_0 : i32, i32
  }
  func.func @transform_2(%arg0: i32) -> (i32, i32) {
    %c0_i32 = arith.constant 0 : i32
    %c0_i32_0 = arith.constant 0 : i32
    %c0_i32_1 = arith.constant 0 : i32
    return %c0_i32, %c0_i32_0 : i32, i32
  }
  func.func @transform_3(%arg0: i32) -> (i32, i32) {
    %c0_i32 = arith.constant 0 : i32
    %c0_i32_0 = arith.constant 0 : i32
    %c0_i32_1 = arith.constant 0 : i32
    return %c0_i32, %c0_i32_0 : i32, i32
  }
  func.func @transform_4(%arg0: i32) -> (i32, i32) {
    %c0_i32 = arith.constant 0 : i32
    %c0_i32_0 = arith.constant 0 : i32
    %c0_i32_1 = arith.constant 0 : i32
    return %c0_i32, %c0_i32_0 : i32, i32
  }
  func.func @transform_5(%arg0: i32) -> (i32, i32) {
    %c0_i32 = arith.constant 0 : i32
    %c0_i32_0 = arith.constant 0 : i32
    return %arg0, %c0_i32 : i32, i32
  }
}

</mosaic_0001>

<bundles_post_ra>
// kernel: tpu_custom_call.1
= control target key start
LH: loop header
LB: loop body
LE: loop exit
PB: predicated region body
PF: predicated region fallthrough
CT: control target
= control target key end

     0   :  { %10 = vsyncpa [#allocation3], 0  ;;  %s617_s0 = inlined_call_operand.vmem [shape: f32[8,4], index: 0, kind: input, shape index: {}]   ;;  %s618_s1 = inlined_call_operand.vmem [shape: f32[4,128], index: 1, kind: input, shape index: {}]   ;;  %s619_s2 = inlined_call_operand.hbm [shape: bf16[128,128], index: 2, kind: input, shape index: {}]   ;;  %s620_s3 = inlined_call_operand.hbm [shape: bf16[128,128], index: 3, kind: input, shape index: {}]   ;;  %s621_s4 = inlined_call_operand.vmem [shape: f32[3,128], index: 4, kind: input, shape index: {}]   ;;  %s622_s5 = inlined_call_operand.hbm [shape: f32[8,128], index: 5, kind: output, shape index: {}]  }
   0x1   :  { %11 = vsyncpa [#allocation6], 0 }
   0x2   :  { %12 = vsyncpa [#allocation4], 0  ;;  %s513_s18 = smov [#allocation2]   ;;  %s441_s22 = scalar_lea.hbm %s619_s2, 1024 }
   0x3   :  { %s22_s19 = sshll.u32 %s513_s18, 4  ;;  %p442_p0 = scmp.ne.s32.totalorder %s619_s2, %s441_s22  ;;  %s23_s19 = int_to_ptr.vmem [resolvable:$true] %s22_s19 }
   0x4   :  { %p445_p1 = scmp.lt.u32.totalorder %s441_s22, %s619_s2 }
   0x6   :  { %p447_p2 = pnand %p445_p1, %p442_p0 }
   0x8   :  { %450 = shalt.err (!%p447_p2)
}
   0x9   :  { %s451_s27 = scalar_lea.vmem %s23_s19, 1024  ;;  %p456_p4 = scmp.lt.s32.totalorder %s23_s19, %s23_s19 }
   0xa   :  { %p452_p3 = scmp.ne.s32.totalorder %s23_s19, %s451_s27  ;;  %p457_p5 = scmp.lt.s32.totalorder %s451_s27, %s451_s27 }
   0xc   :  { %p458_p6 = por %p457_p5, %p456_p4 }
   0xe   :  { %p459_p7 = pnand %p458_p6, %p452_p3 }
  0x10   :  { %462 = shalt.err (!%p459_p7)
}
  0x11   :  { %s514_s28 = smov 64   ;;  %s515_s29 = smov 4  }
  0x12   :  { %28 = dma.hbm_to_vmem [thread:$0]  %s619_s2, 1024, %s23_s19, [#allocation3], %s514_s28, %s514_s28, %s515_s29  }
  0x13   :  { %s516_s7 = smov [#allocation5]   ;;  %s463_s11 = scalar_lea.hbm %s620_s3, 1024 }
  0x14   :  { %s34_s8 = sshll.u32 %s516_s7, 4  ;;  %p464_p8 = scmp.ne.s32.totalorder %s620_s3, %s463_s11  ;;  %s35_s8 = int_to_ptr.vmem [resolvable:$true] %s34_s8 }
  0x15   :  { %p467_p9 = scmp.lt.u32.totalorder %s463_s11, %s620_s3 }
  0x17   :  { %p469_p10 = pnand %p467_p9, %p464_p8 }
  0x19   :  { %472 = shalt.err (!%p469_p10)
}
  0x1a   :  { %s473_s16 = scalar_lea.vmem %s35_s8, 1024  ;;  %p478_p12 = scmp.lt.s32.totalorder %s35_s8, %s35_s8 }
  0x1b   :  { %p474_p11 = scmp.ne.s32.totalorder %s35_s8, %s473_s16  ;;  %p479_p13 = scmp.lt.s32.totalorder %s473_s16, %s473_s16 }
  0x1d   :  { %p480_p0 = por %p479_p13, %p478_p12 }
  0x1f   :  { %p481_p1 = pnand %p480_p0, %p474_p11 }
  0x21   :  { %484 = shalt.err (!%p481_p1)
}
  0x22   :  { %40 = dma.hbm_to_vmem [thread:$0]  %s620_s3, 1024, %s35_s8, [#allocation6], %s514_s28, %s514_s28, %s515_s29  }
  0x23   :  { %507 = dma.done.wait [#allocation3], 1024  }
  0x24   :  { %508 = vsyncadd [#allocation3], 4294966272 }
  0x25   :  { %509 = dma.done.wait [#allocation6], 1024  }
  0x26   :  { %510 = vsyncadd [#allocation6], 4294966272  ;;  %v517_v0 = vmov 0   ;;  %v518_v1 = vmov 2   ;;  %v519_v2 = vmov 0.0   ;;  %v50_v3 = vld [vmem:[%s617_s0] sm:$0xff]  ;;  %v58_v20 = vlaneseq }
  0x27   :  { %420 = vset.pattern.permute.xlu0 %v517_v0  ;;  %422 = vset.pattern.permute.xlu1 %v518_v1  ;;  %v425_v4 = vld [vmem:[#allocation2] sm:$0xff]   ;;  %v426_v5 = vld [vmem:[#allocation2 + $0x8] sm:$0xff]   ;;  %v520_v6 = vmov 1   ;;  %v521_v7 = vmov 3   ;;  %v427_v8 = vld [vmem:[#allocation2 + $0x10] sm:$0xff]   ;;  %vm522_vm0 = vmmov 0  }
  0x28   :  { %369 = vmatprep.subr.bf16.mxu0 %v519_v2  ;;  %389 = vmatprep.subr.bf16.mxu1 %v519_v2  ;;  %v428_v9 = vld [vmem:[#allocation2 + $0x18] sm:$0xff]   ;;  %v429_v10 = vld [vmem:[#allocation2 + $0x20] sm:$0xff]   ;;  %v430_v11 = vld [vmem:[#allocation2 + $0x28] sm:$0xff]   ;;  %v59_v21 = vshrl.u32 %v58_v20, 7 }
  0x29   :  { %55 = vperm.xlu0 %420, %v50_v3   ;;  %74 = vperm.xlu1 %422, %v50_v3   ;;  %v433_v12 = vld [vmem:[#allocation5] sm:$0xff]   ;;  %v434_v13 = vld [vmem:[#allocation5 + $0x8] sm:$0xff]   ;;  %v431_v14 = vld [vmem:[#allocation2 + $0x30] sm:$0xff]  }
  0x2a   :  { %370 = vmatpush3.bf16.msra.mxu0 %v425_v4  ;;  %385 = vmatprep.mubr.msk.bf16.mxu0 %vm522_vm0, %v519_v2  ;;  %v435_v15 = vld [vmem:[#allocation5 + $0x10] sm:$0xff]   ;;  %v432_v16 = vld [vmem:[#allocation2 + $0x38] sm:$0xff]   ;;  %v437_v18 = vld [vmem:[#allocation5 + $0x20] sm:$0xff]   ;;  %v60_v22 = vsub.s32 0, %v59_v21  ;;  %v69_v23 = vsub.s32 1, %v59_v21  ;;  %v79_v26 = vsub.s32 2, %v59_v21 }
  0x2b   :  { %371 = vmatprep.subr.bf16.mxu0 %v519_v2  ;;  %405 = vmatprep.mubr.msk.bf16.mxu1 %vm522_vm0, %v519_v2  ;;  %v436_v17 = vld [vmem:[#allocation5 + $0x18] sm:$0xff]   ;;  %v438_v19 = vld [vmem:[#allocation5 + $0x28] sm:$0xff]   ;;  %v51_v24 = vld [vmem:[%s618_s1] sm:$0xf]  ;;  %v89_v28 = vsub.s32 3, %v59_v21  ;;  %s523_s1 = smov [#allocation7]  }
  0x2c   :  { %390 = vmatpush3.bf16.msra.mxu1 %v433_v12  ;;  %v61_v29 = vrot.slane %v51_v24, %v60_v22  ;;  %v70_v30 = vrot.slane %v51_v24, %v69_v23  ;;  %v80_v31 = vrot.slane %v51_v24, %v79_v26  ;;  %v52_v37 = vld [vmem:[%s621_s4] sm:$0x7]  ;;  %v439_v47 = vld [vmem:[#allocation5 + $0x30] sm:$0xff]   ;;  %v440_v48 = vld [vmem:[#allocation5 + $0x38] sm:$0xff]   ;;  %s325_s4 = sshll.u32 %s523_s1, 4  ;;  %s326_s4 = int_to_ptr.vmem [resolvable:$true] %s325_s4 }
  0x2d   :  { %421 = vset.pattern.permute.xlu0 %v520_v6  ;;  %423 = vset.pattern.permute.xlu1 %v521_v7  ;;  %v90_v32 = vrot.slane %v51_v24, %v89_v28  ;;  %v96_v41 = vrot.slane %v52_v37, %v60_v22  ;;  %v119_v49 = vrot.slane %v52_v37, %v69_v23  ;;  %s485_s22 = scalar_lea.vmem %s326_s4, 128  ;;  %p490_p3 = scmp.lt.s32.totalorder %s326_s4, %s326_s4 }
  0x2e   :  { %64 = vperm.xlu0 %421, %v50_v3   ;;  %84 = vperm.xlu1 %423, %v50_v3   ;;  %v229_v57 = vrot.slane %v52_v37, %v79_v26  ;;  %p486_p2 = scmp.ne.s32.totalorder %s326_s4, %s485_s22  ;;  %p491_p4 = scmp.lt.s32.totalorder %s485_s22, %s485_s22 }
  0x2f   :  { %372 = vmatpush3.bf16.msra.mxu0 %v426_v5  ;;  %391 = vmatprep.subr.bf16.mxu1 %v519_v2 }
  0x30   :  { %373 = vmatprep.subr.bf16.mxu0 %v519_v2  ;;  %392 = vmatpush3.bf16.msra.mxu1 %v434_v13  ;;  %p492_p5 = por %p491_p4, %p490_p3 }
  0x31   :  { %393 = vmatprep.subr.bf16.mxu1 %v519_v2 }
  0x32   :  { %424 = vset.pattern.permute.xlu0 %v521_v7  ;;  %p493_p6 = pnand %p492_p5, %p486_p2 }
  0x33   :  { %374 = vmatpush3.bf16.msra.mxu0 %v427_v8 }
  0x34   :  { %375 = vmatprep.subr.bf16.mxu0 %v519_v2  ;;  %394 = vmatpush3.bf16.msra.mxu1 %v435_v15 }
  0x35   :  { %395 = vmatprep.subr.bf16.mxu1 %v519_v2 }
  0x37   :  { %376 = vmatpush3.bf16.msra.mxu0 %v428_v9 }
  0x38   :  { %377 = vmatprep.subr.bf16.mxu0 %v519_v2  ;;  %396 = vmatpush3.bf16.msra.mxu1 %v436_v17 }
  0x39   :  { %397 = vmatprep.subr.bf16.mxu1 %v519_v2 }
  0x3b   :  { %378 = vmatpush3.bf16.msra.mxu0 %v429_v10 }
  0x3c   :  { %379 = vmatprep.subr.bf16.mxu0 %v519_v2  ;;  %398 = vmatpush3.bf16.msra.mxu1 %v437_v18 }
  0x3d   :  { %399 = vmatprep.subr.bf16.mxu1 %v519_v2 }
  0x3f   :  { %380 = vmatpush3.bf16.msra.mxu0 %v430_v11 }
  0x40   :  { %381 = vmatprep.subr.bf16.mxu0 %v519_v2  ;;  %400 = vmatpush3.bf16.msra.mxu1 %v438_v19 }
  0x41   :  { %401 = vmatprep.subr.bf16.mxu1 %v519_v2 }
  0x43   :  { %382 = vmatpush3.bf16.msra.mxu0 %v431_v14 }
  0x44   :  { %383 = vmatprep.subr.bf16.mxu0 %v519_v2  ;;  %402 = vmatpush3.bf16.msra.mxu1 %v439_v47 }
  0x45   :  { %403 = vmatprep.subr.bf16.mxu1 %v519_v2 }
  0x47   :  { %384 = vmatpush3.bf16.msra.mxu0 %v432_v16 }
  0x48   :  { %404 = vmatpush3.bf16.msra.mxu1 %v440_v48 }
  0xa8   :  { %v56_v25 = vpop.permute.xlu0 %55  ;;  %v75_v27 = vpop.permute.xlu1 %74 }
  0xa9   :  { %v62_v35 = vmul.f32 %v61_v29, %v56_v25  ;;  %v81_v38 = vmul.f32 %v80_v31, %v75_v27 }
  0xad   :  { %v65_v33 = vpop.permute.xlu0 %64  ;;  %v85_v34 = vpop.permute.xlu1 %84 }
  0xae   :  { %v71_v36 = vmul.f32 %v70_v30, %v65_v33  ;;  %v91_v40 = vmul.f32 %v90_v32, %v85_v34 }
  0xb0   :  { %v72_v39 = vadd.f32 %v71_v36, %v62_v35 }
  0xb2   :  { %v82_v42 = vadd.f32 %v81_v38, %v72_v39 }
  0xb4   :  { %v92_v43 = vadd.f32 %v91_v40, %v82_v42 }
  0xb6   :  { %v97_v44 = vadd.f32 %v96_v41, %v92_v43 }
  0xb8   :  { %v98_v45 = vmax.f32 %v97_v44, 0.0 }
  0xba   :  { %v99_v46 = vpack.c.bf16 %v98_v45, %v98_v45 }
  0xbc   :  { %386 = vmatmul.mubr.bf16.vlgmr.msra.gmra.mrb[0].mxu0 %v99_v46 }
 0x18f   :  { %v202_v50 = vpop.f32.mrb[0].mxu0 }
 0x190   :  { %v203_v51 = vadd.f32 %v202_v50, %v119_v49  ;;  %v387_v52 = vpop.f32.mrb[1].mxu0 }
 0x191   :  { %v205_v53 = vpop.f32.mrb[2].mxu0 }
 0x192   :  { %v208_v54 = vmax.f32 %v203_v51, 0.0  ;;  %v388_v55 = vpop.f32.mrb[3].mxu0 }
 0x194   :  { %v209_v56 = vpack.c.bf16 %v208_v54, %v208_v54 }
 0x196   :  { %406 = vmatmul.mubr.bf16.vlgmr.msra.gmra.mrb[0].mxu1 %v209_v56 }
 0x269   :  { %v312_v58 = vpop.f32.mrb[0].mxu1 }
 0x26a   :  { %v313_v59 = vadd.f32 %v312_v58, %v229_v57  ;;  %v407_v60 = vpop.f32.mrb[1].mxu1 }
 0x26b   :  { %v315_v61 = vpop.f32.mrb[2].mxu1 }
 0x26c   :  { %318 = vst [vmem:[#allocation7] sm:$0xff] %v313_v59  ;;  %v408_v62 = vpop.f32.mrb[3].mxu1 }
 0x26d   :  { %496 = shalt.err (!%p493_p6)
}
 0x26e   :  { %s497_s25 = scalar_lea.hbm %s622_s5, 128 }
 0x26f   :  { %p498_p7 = scmp.ne.s32.totalorder %s622_s5, %s497_s25  ;;  %p501_p8 = scmp.lt.u32.totalorder %s497_s25, %s622_s5 }
 0x271   :  { %p503_p9 = pnand %p501_p8, %p498_p7 }
 0x273   :  { %506 = shalt.err (!%p503_p9)
}
 0x274   :  { %328 = dma.vmem_to_hbm [thread:$0]  %s326_s4, 128, %s622_s5, [#allocation4]  }
 0x275   :  { %511 = dma.done.wait [#allocation4], 128  }
 0x276   :  { %512 = vsyncadd [#allocation4], 4294967168 }
 0x277   :  { %332 = vsyncpa [#allocation3], 1 }
 0x278   :  { %333 = vsyncpa [#allocation6], 1 }
 0x279   :  { %334 = vsyncpa [#allocation4], 1 }

</bundles_post_ra>
